<compile_context>
chip_gen: v7x
topology: tpu7x:2x2x1
jax: 0.10.0
libtpu: 0.0.40
codegen_flags: <defaults>
</compile_context>

<pallas_src>
import functools
import math

import jax
import jax.numpy as jnp
from jax.experimental import pallas as pl
from jax.experimental.pallas import tpu as pltpu


def _round_up(a: int, b: int) -> int:
    return (a + b - 1) // b * b


def _erf(x):
    # Abramowitz & Stegun 7.1.26.  Implemented in-kernel because lax.erf is not
    # guaranteed to lower in Mosaic.  The approximate EUP reciprocal degrades
    # the polynomial to ~1e-3 relative error, which is well inside the bf16
    # matmul pipeline's error budget.
    a1, a2, a3, a4, a5 = (0.254829592, -0.284496736, 1.421413741,
                          -1.453152027, 1.061405429)
    p = 0.3275911
    ax = jnp.abs(x)
    t = pl.reciprocal(1.0 + p * ax, approx=True)   # EUP slot -> nearly free
    poly = ((((a5 * t + a4) * t + a3) * t + a2) * t + a1) * t
    y = 1.0 - poly * jnp.exp(-ax * ax)
    return jnp.where(x >= 0.0, y, -y)


def _gelu_exact(x):
    # Matches torch.nn.GELU() default (erf-based).
    return 0.5 * x * (1.0 + _erf(x * (1.0 / math.sqrt(2.0))))


def expert_kernel(x_ref, wd_ref, wu_ref, o_ref):
    # x_ref:  (tm, H)  f32 token tile (cast to bf16 here, under the DMA)
    # wd_ref: (H, Bn)  bf16 down-proj weight (pre-transposed)
    # wu_ref: (Bn, H)  bf16 up-proj weight (pre-transposed, scale folded in)
    # o_ref:  (tm, H)  output tile
    x = x_ref[...].astype(jnp.bfloat16)
    h = jnp.dot(x, wd_ref[...], preferred_element_type=jnp.float32)
    h = _gelu_exact(h)                              # f32 (correct on v5e too)
    y = jnp.dot(h.astype(jnp.bfloat16), wu_ref[...],
                preferred_element_type=jnp.float32)
    o_ref[...] = y.astype(o_ref.dtype)


def _vmem_capacity_bytes() -> int:
    try:
        return int(pltpu.get_tpu_info().vmem_capacity_bytes)
    except Exception:
        return 64 << 20     # conservative (v7x per-TC) fallback


@functools.partial(jax.jit, static_argnames=("tm", "out_dtype"))
def expert_forward(x, w_down, w_up, scale, *, tm=None, out_dtype=jnp.float32):
    """x: (B, S, H) f32. w_down: (Bn, H). w_up: (H, Bn). scale: (1,) f32."""
    B, S, H = x.shape
    Bn = w_down.shape[0]
    T = B * S

    # Token-major slab; reshape is free (no HBM pass).
    x2 = x.reshape(T, H)

    # nn.Linear weights are (out, in); pre-transpose for row-major matmuls and
    # fold the learnable scalar into the up-projection (one-time (Bn,H) ops).
    wd_t = w_down.T.astype(jnp.bfloat16)              # (H, Bn)
    wu_t = (w_up * scale[0]).T.astype(jnp.bfloat16)   # (Bn, H)

    # --- token tile selection -------------------------------------------------
    if tm is None:
        # ~4 MiB per f32 x tile (same for the out tile).
        tm = max(256, min(4096, (4 << 20) // max(4 * H, 1)))
    if T <= 8:
        tm_eff = T                                  # single full-dim block
    else:
        # Multiple of 8 (sublane rule) and small enough that the grid has >= 2
        # steps, so the "parallel" axis shards across v7x's two TensorCores.
        half = _round_up((T + 1) // 2, 8)
        tm_eff = max(8, min(_round_up(tm, 8), half))
    grid = ((T + tm_eff - 1) // tm_eff,)

    # --- VMEM budget ----------------------------------------------------------
    est = (2 * tm_eff * H * 4        # x tiles   (f32, double-buffered)
           + 2 * tm_eff * H * 4      # out tiles (f32, double-buffered)
           + H * Bn * 2 + Bn * H * 2 # both weights (bf16, single-buffered)
           + tm_eff * Bn * 4         # (tm, Bn) f32 intermediate
           + tm_eff * H * 2 + tm_eff * Bn * 2)   # bf16 temporaries
    cap = _vmem_capacity_bytes()
    vmem_limit = int(min(max(int(est * 1.5) + (8 << 20), 32 << 20),
                         cap - (8 << 20)))

    # --- cost hint for XLA's scheduler ----------------------------------------
    cost = pl.CostEstimate(
        flops=4 * T * H * Bn,                       # two matmuls
        transcendentals=2 * T * Bn,                 # exp + recip per GELU elt
        bytes_accessed=T * H * 4                    # x in (f32)
        + T * H * jnp.dtype(out_dtype).itemsize     # out
        + 2 * H * Bn * 2)                           # both weights (bf16)

    out = pl.pallas_call(
        expert_kernel,
        out_shape=jax.ShapeDtypeStruct((T, H), out_dtype),
        grid=grid,
        in_specs=[
            pl.BlockSpec((tm_eff, H), lambda i: (i, 0)),                # x tile
            pl.BlockSpec((H, Bn), lambda i: (0, 0),
                         pipeline_mode=pl.Buffered(1)),                 # W_down^T
            pl.BlockSpec((Bn, H), lambda i: (0, 0),
                         pipeline_mode=pl.Buffered(1)),                 # W_up^T (scaled)
        ],
        out_specs=pl.BlockSpec((tm_eff, H), lambda i: (i, 0)),
        compiler_params=pltpu.CompilerParams(
            dimension_semantics=("parallel",),
            vmem_limit_bytes=vmem_limit),
        cost_estimate=cost,
    )(x2, wd_t, wu_t)

    return out.reshape(B, S, H)


if __name__ == "__main__":
    hidden_size = 32
    bottleneck = 64
    batch, seq = 2, 8

    key = jax.random.PRNGKey(0)
    kx, kd, ku = jax.random.split(key, 3)

    x = jax.random.normal(kx, (batch, seq, hidden_size), dtype=jnp.float32)
    # nn.Linear weights are (out_features, in_features); deterministic init.
    bound_d = 1.0 / math.sqrt(hidden_size)
    bound_u = 1.0 / math.sqrt(bottleneck)
    w_down = jax.random.uniform(kd, (bottleneck, hidden_size),
                                minval=-bound_d, maxval=bound_d,
                                dtype=jnp.float32)
    w_up = jax.random.uniform(ku, (hidden_size, bottleneck),
                              minval=-bound_u, maxval=bound_u,
                              dtype=jnp.float32)
    # The module inits scale to zeros; use a nonzero deterministic value so the
    # kernel's output is exercised end-to-end.
    scale = jnp.array([0.1], dtype=jnp.float32)

    out = expert_forward(x, w_down, w_up, scale)
    out = jax.block_until_ready(out)

    # Pure-JAX f32 reference (exact erf GELU, matching torch.nn.GELU()).
    ref = scale[0] * (jax.nn.gelu(x @ w_down.T, approximate=False) @ w_up.T)
    assert out.shape == (batch, seq, hidden_size)
    assert out.dtype == jnp.float32
    # bf16 matmul inputs -> loosened tolerance vs the f32 reference.
    assert jnp.allclose(out, ref, atol=1e-2, rtol=1e-2), (
        float(jnp.max(jnp.abs(out - ref))))

    print("KERNEL_OK")
</pallas_src>

<mosaic_0001>
module attributes {stable_mosaic.version = 11 : i64} {
  func.func @expert_kernel(%arg0: i32, %arg1: memref<8x32xf32, #tpu.memory_space<vmem>>, %arg2: memref<32x64xbf16, #tpu.memory_space<vmem>>, %arg3: memref<64x32xbf16, #tpu.memory_space<vmem>>, %arg4: memref<8x32xf32, #tpu.memory_space<vmem>>) attributes {dimension_semantics = [#tpu.dimension_semantics<parallel>], iteration_bounds = array<i64: 2>, scalar_prefetch = 0 : i64, scratch_operands = 0 : i64, tpu.core_type = #tpu.core_type<tc>, window_params = [{transform_indices = @transform_0, window_bounds = array<i64: 8, 32>}, {pipeline_mode = #tpu.pipeline_mode<synchronous>, transform_indices = @transform_1, window_bounds = array<i64: 32, 64>}, {pipeline_mode = #tpu.pipeline_mode<synchronous>, transform_indices = @transform_2, window_bounds = array<i64: 64, 32>}, {transform_indices = @transform_3, window_bounds = array<i64: 8, 32>}]} {
    %c0 = arith.constant 0 : index
    %c0_0 = arith.constant 0 : index
    %0 = vector.load %arg1[%c0, %c0_0] : memref<8x32xf32, #tpu.memory_space<vmem>>, vector<8x32xf32>
    %1 = arith.truncf %0 : vector<8x32xf32> to vector<8x32xbf16>
    %c0_1 = arith.constant 0 : index
    %c0_2 = arith.constant 0 : index
    %2 = vector.load %arg2[%c0_1, %c0_2] : memref<32x64xbf16, #tpu.memory_space<vmem>>, vector<32x64xbf16>
    %cst = arith.constant dense<0.000000e+00> : vector<8x64xf32>
    %3 = tpu.matmul %1, %2, %cst {dimension_numbers = #tpu.dot_dimension_numbers<[1], [0], [0], [1], [0, 0, 1, 1], [], []>} : vector<8x32xbf16>, vector<32x64xbf16>, vector<8x64xf32> -> vector<8x64xf32>
    %cst_3 = arith.constant 5.000000e-01 : f32
    %4 = vector.broadcast %cst_3 : f32 to vector<8x64xf32>
    %5 = arith.mulf %4, %3 : vector<8x64xf32>
    %cst_4 = arith.constant 0.707106769 : f32
    %6 = vector.broadcast %cst_4 : f32 to vector<8x64xf32>
    %7 = arith.mulf %3, %6 : vector<8x64xf32>
    %8 = math.absf %7 : vector<8x64xf32>
    %cst_5 = arith.constant 0.327591091 : f32
    %9 = vector.broadcast %cst_5 : f32 to vector<8x64xf32>
    %10 = arith.mulf %9, %8 : vector<8x64xf32>
    %cst_6 = arith.constant 1.000000e+00 : f32
    %11 = vector.broadcast %cst_6 : f32 to vector<8x64xf32>
    %12 = arith.addf %11, %10 : vector<8x64xf32>
    %13 = tpu.reciprocal %12 {approx = true} : vector<8x64xf32> -> vector<8x64xf32>
    %cst_7 = arith.constant 1.06140542 : f32
    %14 = vector.broadcast %cst_7 : f32 to vector<8x64xf32>
    %15 = arith.mulf %14, %13 : vector<8x64xf32>
    %cst_8 = arith.constant -1.45315206 : f32
    %16 = vector.broadcast %cst_8 : f32 to vector<8x64xf32>
    %17 = arith.addf %15, %16 : vector<8x64xf32>
    %18 = arith.mulf %17, %13 : vector<8x64xf32>
    %cst_9 = arith.constant 1.42141378 : f32
    %19 = vector.broadcast %cst_9 : f32 to vector<8x64xf32>
    %20 = arith.addf %18, %19 : vector<8x64xf32>
    %21 = arith.mulf %20, %13 : vector<8x64xf32>
    %cst_10 = arith.constant -0.284496725 : f32
    %22 = vector.broadcast %cst_10 : f32 to vector<8x64xf32>
    %23 = arith.addf %21, %22 : vector<8x64xf32>
    %24 = arith.mulf %23, %13 : vector<8x64xf32>
    %cst_11 = arith.constant 0.254829586 : f32
    %25 = vector.broadcast %cst_11 : f32 to vector<8x64xf32>
    %26 = arith.addf %24, %25 : vector<8x64xf32>
    %27 = arith.mulf %26, %13 : vector<8x64xf32>
    %cst_12 = arith.constant 0.000000e+00 : f32
    %28 = vector.broadcast %cst_12 : f32 to vector<8x64xf32>
    %29 = arith.subf %28, %8 : vector<8x64xf32>
    %30 = arith.mulf %29, %8 : vector<8x64xf32>
    %31 = math.exp %30 : vector<8x64xf32>
    %32 = arith.mulf %27, %31 : vector<8x64xf32>
    %cst_13 = arith.constant 1.000000e+00 : f32
    %33 = vector.broadcast %cst_13 : f32 to vector<8x64xf32>
    %34 = arith.subf %33, %32 : vector<8x64xf32>
    %cst_14 = arith.constant 0.000000e+00 : f32
    %35 = vector.broadcast %cst_14 : f32 to vector<8x64xf32>
    %36 = arith.cmpf oge, %7, %35 : vector<8x64xf32>
    %cst_15 = arith.constant 0.000000e+00 : f32
    %37 = vector.broadcast %cst_15 : f32 to vector<8x64xf32>
    %38 = arith.subf %37, %34 : vector<8x64xf32>
    %39 = arith.select %36, %34, %38 : vector<8x64xi1>, vector<8x64xf32>
    %cst_16 = arith.constant 1.000000e+00 : f32
    %40 = vector.broadcast %cst_16 : f32 to vector<8x64xf32>
    %41 = arith.addf %40, %39 : vector<8x64xf32>
    %42 = arith.mulf %5, %41 : vector<8x64xf32>
    %43 = arith.truncf %42 : vector<8x64xf32> to vector<8x64xbf16>
    %c0_17 = arith.constant 0 : index
    %c0_18 = arith.constant 0 : index
    %44 = vector.load %arg3[%c0_17, %c0_18] : memref<64x32xbf16, #tpu.memory_space<vmem>>, vector<64x32xbf16>
    %cst_19 = arith.constant dense<0.000000e+00> : vector<8x32xf32>
    %45 = tpu.matmul %43, %44, %cst_19 {dimension_numbers = #tpu.dot_dimension_numbers<[1], [0], [0], [1], [0, 0, 1, 1], [], []>} : vector<8x64xbf16>, vector<64x32xbf16>, vector<8x32xf32> -> vector<8x32xf32>
    %c0_20 = arith.constant 0 : index
    %c0_21 = arith.constant 0 : index
    %46 = vector.load %arg4[%c0_20, %c0_21] : memref<8x32xf32, #tpu.memory_space<vmem>>, vector<8x32xf32>
    tpu.vector_store %arg4[%c0_20, %c0_21], %45 {strides = array<i32>} : memref<8x32xf32, #tpu.memory_space<vmem>>, vector<8x32xf32>,
    return
  }
  func.func @transform_0(%arg0: i32) -> (i32, i32) {
    %c0_i32 = arith.constant 0 : i32
    %c0_i32_0 = arith.constant 0 : i32
    return %arg0, %c0_i32 : i32, i32
  }
  func.func @transform_1(%arg0: i32) -> (i32, i32) {
    %c0_i32 = arith.constant 0 : i32
    %c0_i32_0 = arith.constant 0 : i32
    %c0_i32_1 = arith.constant 0 : i32
    return %c0_i32, %c0_i32_0 : i32, i32
  }
  func.func @transform_2(%arg0: i32) -> (i32, i32) {
    %c0_i32 = arith.constant 0 : i32
    %c0_i32_0 = arith.constant 0 : i32
    %c0_i32_1 = arith.constant 0 : i32
    return %c0_i32, %c0_i32_0 : i32, i32
  }
  func.func @transform_3(%arg0: i32) -> (i32, i32) {
    %c0_i32 = arith.constant 0 : i32
    %c0_i32_0 = arith.constant 0 : i32
    return %arg0, %c0_i32 : i32, i32
  }
}

</mosaic_0001>

<bundles_post_ra>
// kernel: expert_forward.1
= control target key start
LH: loop header
LB: loop body
LE: loop exit
PB: predicated region body
PF: predicated region fallthrough
CT: control target
= control target key end

     0   :  { %8 = vsyncpa [#allocation3], 0  ;;  %s710_s0 = inlined_call_operand.vmem [shape: f32[16,32], index: 0, kind: input, shape index: {}]   ;;  %s711_s1 = inlined_call_operand.vmem [shape: bf16[32,64], index: 1, kind: input, shape index: {}]   ;;  %s712_s2 = inlined_call_operand.vmem [shape: bf16[64,32], index: 2, kind: input, shape index: {}]   ;;  %s713_s3 = inlined_call_operand.hbm [shape: f32[16,32], index: 3, kind: output, shape index: {}]  }
   0x1   :  { %10 = vsyncpa [#allocation3 + $0x1], 0  ;;  %s590_s12 = smov 0   ;;  %s592_s13 = smov 0  }
   0x2   :  { %s594_s14 = smov 0   ;;  %s596_s15 = smov 0  }
   0x3 LB: > { %s611_s16 = sadd.s32 4294967295, %s565_s15   ;;  %s406_s17 = sadd.s32 4294967294, %s565_s15   ;;  %s565_s15 = sphi %s596_s15, %s719_s15   ;;  %s561_s14 = sphi %s594_s14, %s718_s14   ;;  %s557_s13 = sphi %s592_s13, %s717_s13   ;;  %s553_s12 = sphi %s590_s12, %s716_s12  }
   0x4   : > { %s615_s18 = sadd.s32 1, %s565_s15   ;;  %s91_s19 = sadd.s32 1, %s561_s14 }
   0x5   : > { %s88_s20 = ssub.s32 %s565_s15, %s615_s18  ;;  %p101_p0 = scmp.ne.s32.totalorder %s561_s14, %s557_s13 }
   0x6   : > { %p89_p1 = scmp.eq.s32.totalorder %s88_s20, 0  ;;  %p102_p2 = scmp.eq.s32.totalorder %s611_s16, 1 }
   0x7   : > { %p107_p3 = scmp.ne.s32.totalorder %s557_s13, %s553_s12  ;;  %p108_p4 = scmp.eq.s32.totalorder %s406_s17, 1 }
   0x8   : > { %s626_s21 = scalar_select %p89_p1, %s561_s14, %s91_s19  }
   0x9   : > { %p628_p5 = por %p102_p2, %p101_p0  ;;  %p632_p6 = por %p108_p4, %p107_p3 }
   0xa   : > { %p409_p7 = scmp.ge.s32.totalorder %s565_s15, 1  ;;  %p139_p8 = scmp.lt.s32.totalorder %s565_s15, 3 }
   0xc   : > { %p140_p9 = pnand %p409_p7, %p139_p8 }
   0xd   : > { %v493_v0 = vld [vmem:[%s711_s1] sm:$0xff] (!%p140_p9)   ;;  %v567_v1 = vmov (!%p140_p9), 0.0   ;;  %v494_v2 = vld [vmem:[%s711_s1 + $0x8] sm:$0xff] (!%p140_p9)   ;;  %vm568_vm0 = vmmov (!%p140_p9), 0   ;;  %p162_p10 = scmp.lt.s32.totalorder (!%p140_p9), %s611_s16, 1  ;;  %vm185_vm1 = vcmask (!%p140_p9), 261120  }
   0xe   : > { %143 = sbr.rel (%p140_p9) target bundleno = 517 (0x205), region = 32  ;;  %432 = vmatprep.subr.bf16.mxu0 (!%p140_p9), %v567_v1  ;;  %440 = vmatprep.subr.bf16.mxu1 (!%p140_p9), %v567_v1  ;;  %v495_v5 = vld [vmem:[%s712_s2] sm:$0xff] (!%p140_p9)   ;;  %v496_v6 = vld [vmem:[%s712_s2 + $0x8] sm:$0xff] (!%p140_p9)   ;;  %v497_v7 = vld [vmem:[%s712_s2 + $0x10] sm:$0xff] (!%p140_p9)   ;;  %vm288_vm3 = vcmask (!%p140_p9), 523264   ;;  %s159_s20 = sand.u32 (!%p140_p9), 1, %s557_s13  }
   0xf   : > { %433 = vmatpush3.bf16.msra.mxu0 (!%p140_p9), %v493_v0  ;;  %436 = vmatprep.mubr.msk.bf16.mxu0 (!%p140_p9), %vm568_vm0, %v567_v1  ;;  %v498_v8 = vld [vmem:[%s712_s2 + $0x18] sm:$0xff] (!%p140_p9)   ;;  %s410_s24 = sshll.u32 (!%p140_p9), %s159_s20, 3  ;;  %s421_s25 = sshll.u32 (!%p140_p9), %s611_s16, 7 }
  0x10   : > { %434 = vmatprep.subr.bf16.mxu0 (!%p140_p9), %v567_v1  ;;  %448 = vmatprep.mubr.msk.bf16.mxu1 (!%p140_p9), %vm568_vm0, %v567_v1  ;;  %s161_s26 = scalar_lea.vmem (!%p140_p9), [#allocation2], %s410_s24  ;;  %s667_s30 = scalar_lea.hbm (!%p140_p9), %s713_s3, %s421_s25 }
  0x11   : > { %441 = vmatpush3.bf16.msra.mxu1 (!%p140_p9), %v495_v5  ;;  %s347_s27 = sshll.u32 (!%p140_p9), %s161_s26, 4  ;;  %s334_s4 = scalar_lea.sflag (!%p140_p9), [#allocation3], %s159_s20  ;;  %s669_s27 = int_to_ptr.vmem [resolvable:$true] %s347_s27 }
  0x12   : > { %442 = vmatprep.subr.bf16.mxu1 (!%p140_p9), %v567_v1 }
  0x13   : > { %435 = vmatpush3.bf16.msra.mxu0 (!%p140_p9), %v494_v2 }
  0x15   : > { %s163_s28 = scalar_select %p162_p10, %s611_s16, 1  ;;  %443 = vmatpush3.bf16.msra.mxu1 %v496_v6 }
  0x16   : > { %444 = vmatprep.subr.bf16.mxu1 %v567_v1  ;;  %s569_s16 = smov [#allocation2]  }
  0x17   : > { %s411_s29 = sshll.u32 %s163_s28, 3  ;;  %s507_s6 = sshll.u32 %s569_s16, 4  ;;  %s508_s6 = int_to_ptr.vmem [resolvable:$false] %s507_s6 }
  0x18   : > { %s165_s5 = scalar_lea.vmem %s710_s0, %s411_s29  ;;  %s509_s7 = scalar_lea.vmem %s508_s6, 256 }
  0x19   : > { %v167_v3 = vld [vmem:[%s165_s5] sm:$0xff]  ;;  %445 = vmatpush3.bf16.msra.mxu1 %v497_v7  ;;  %s503_s5 = scalar_lea.vmem %s669_s27, 128  ;;  %p510_p0 = scmp.lt.s32.totalorder %s669_s27, %s508_s6 }
  0x1a   : > { %v168_v4 = vpack.c.bf16 %v167_v3, %v167_v3  ;;  %446 = vmatprep.subr.bf16.mxu1 %v567_v1  ;;  %p504_p11 = scmp.ne.s32.totalorder %s669_s27, %s503_s5  ;;  %p511_p1 = scmp.lt.s32.totalorder %s509_s7, %s503_s5 }
  0x1c   : > { %437 = vmatmul.mubr.msk.bf16.vlgmr.msra.gmra.mrb[0].mxu0 %vm185_vm1, %v168_v4  ;;  %p505_p12 = pnand %p504_p11, %p628_p5  ;;  %p512_p2 = por %p511_p1, %p510_p0 }
  0x1d   : > { %447 = vmatpush3.bf16.msra.mxu1 %v498_v8 }
  0x1e   : > { %p506_p13 = pneg %p505_p12 }
  0x20   : > { %p513_p3 = pnand %p512_p2, %p506_p13 }
  0xef   : > { %v223_v9 = vpop.f32.mrb[0].mxu0 }
  0xf0   : > { %v230_v10 = vmul.f32 0.70710677, %v223_v9  ;;  %v438_v11 = vpop.f32.mrb[1].mxu0  ;;  %v229_v35 = vmul.f32 0.5, %v223_v9 }
  0xf1   : > { %v226_v12 = vpop.f32.mrb[2].mxu0 }
  0xf2   : > { %v231_v13 = vand.u32 2147483647, %v230_v10  ;;  %v439_v14 = vpop.f32.mrb[3].mxu0  ;;  %vm250_vm2 = vcmp.ge.f32.partialorder %v230_v10, 0.0 }
  0xf4   : > { %v232_v15 = vmul.f32 0.3275911, %v231_v13  ;;  %v244_v17 = vsub.f32 0.0, %v231_v13 }
  0xf6   : > { %v233_v16 = vadd.f32 1.0, %v232_v15  ;;  %v245_v19 = vmul.f32 %v244_v17, %v231_v13 }
  0xf8   : > { %499 = vrcp.f32 %v233_v16  ;;  %v246_v22 = vmul.f32 1.442695, %v245_v19 }
  0xfa   : > { %501 = vpow2.f32 %v246_v22 }
 0x102   : > { %v500_v18 = vpop.eup %499 }
 0x103   : > { %v235_v20 = vmul.f32 1.0614054, %v500_v18 }
 0x104   : > { %v502_v30 = vpop.eup %501 }
 0x105   : > { %v236_v21 = vadd.f32 -1.4531521, %v235_v20 }
 0x107   : > { %v237_v23 = vmul.f32 %v500_v18, %v236_v21 }
 0x109   : > { %v238_v24 = vadd.f32 1.4214138, %v237_v23 }
 0x10b   : > { %v239_v25 = vmul.f32 %v500_v18, %v238_v24 }
 0x10d   : > { %v240_v26 = vadd.f32 -0.28449672, %v239_v25 }
 0x10f   : > { %v241_v27 = vmul.f32 %v500_v18, %v240_v26 }
 0x111   : > { %v242_v28 = vadd.f32 0.2548296, %v241_v27 }
 0x113   : > { %v243_v29 = vmul.f32 %v500_v18, %v242_v28 }
 0x115   : > { %v248_v31 = vmul.f32 %v502_v30, %v243_v29 }
 0x117   : > { %v249_v32 = vsub.f32 1.0, %v248_v31 }
 0x119   : > { %v251_v33 = vsub.f32 0.0, %v249_v32 }
 0x11b   : > { %v252_v34 = vsel %vm250_vm2, %v249_v32, %v251_v33 }
 0x11c   : > { %v253_v36 = vadd.f32 1.0, %v252_v34 }
 0x11e   : > { %v254_v37 = vmul.f32 %v253_v36, %v229_v35 }
 0x120   : > { %v255_v38 = vpack.c.bf16 %v254_v37, %v254_v37 }
 0x122   : > { %449 = vmatmul.mubr.msk.bf16.vlgmr.msra.gmra.mrb[0].mxu1 %vm288_vm3, %v255_v38 }
 0x1f5   : > { %v326_v39 = vpop.f32.mrb[0].mxu1 }
 0x1f6   : > { %332 = vst.msk [vmem:[%s161_s26] sm:$0xff] %vm185_vm1, %v326_v39  ;;  %v450_v40 = vpop.f32.mrb[1].mxu1 }
 0x1f7   : > { %v329_v41 = vpop.f32.mrb[2].mxu1 }
 0x1f8   : > { %516 = shalt.err (!%p513_p3)
}
 0x1f9   : > { %s517_s8 = scalar_lea.hbm %s667_s30, 128  ;;  %s521_s11 = scalar_lea.hbm %s713_s3, 256 }
 0x1fa   : > { %p518_p4 = scmp.ne.s32.totalorder %s667_s30, %s517_s8  ;;  %p522_p9 = scmp.lt.u32.totalorder %s667_s30, %s713_s3 }
 0x1fb   : > { %p523_p10 = scmp.lt.u32.totalorder %s521_s11, %s517_s8  ;;  %p525_p12 = scmp.lt.u32.totalorder %s517_s8, %s667_s30 }
 0x1fc   : > { %p519_p7 = pnand %p518_p4, %p628_p5 }
 0x1fd   : > { %p524_p11 = por %p523_p10, %p522_p9 }
 0x1fe   : > { %p520_p8 = pneg %p519_p7 }
 0x1ff   : > { %p526_p13 = por %p525_p12, %p524_p11 }
 0x201   : > { %p527_p0 = pnand %p526_p13, %p520_p8 }
 0x203   : > { %530 = shalt.err (!%p527_p0)
}
 0x204   : > { %452 = dma.vmem_to_hbm [thread:$0]  (%p628_p5), %s669_s27, 128, %s667_s30, %s334_s4   ;;  %v451_v42 = vpop.f32.mrb[3].mxu1 }
 0x205 PF: > { %p458_p1 = scmp.ge.s32.totalorder %s565_s15, 2  ;;  %s359_s20 = sand.u32 1, %s553_s12  }
 0x206   : > { %s360_s24 = scalar_lea.sflag [#allocation3], %s359_s20 }
 0x207   : > { %p455_p2 = pnand %p458_p1, %p632_p6 }
 0x209   : > { %548 = dma.done.wait (!%p455_p2), %s360_s24, 128  }
 0x20a   : > { %550 = vsyncadd (!%p455_p2), %s360_s24, 4294967168  ;;  %p13_p3 = scmp.ge.s32.totalorder %s615_s18, 4   ;;  %s716_s12 = smov %s557_s13 }
 0x20b   : > { %s717_s13 = smov %s561_s14  ;;  %s718_s14 = smov %s626_s21 }
 0x20c   : > { %s719_s15 = smov %s615_s18  ;;  %15 = sbr.rel (!%p13_p3) target bundleno = 3 (0x3), region = 67 }
 0x213   :  { %365 = vsyncpa [#allocation3], 1 }
 0x214   :  { %367 = vsyncpa [#allocation3 + $0x1], 1 }

</bundles_post_ra>
